<compile_context>
chip_gen: v6e
topology: v6e:2x2x1
jax: 0.10.0
libtpu: 0.0.40
codegen_flags: <defaults>
</compile_context>

<pallas_src>
import jax
import jax.numpy as jnp
from jax.experimental import pallas as pl
from jax.experimental.pallas import tpu as pltpu

_MAX_TILE_B = 1024  # rows of x per grid step (multiple of 128)


def _round_up(n, m):
    return ((n + m - 1) // m) * m


def mlp_kernel(x_ref, w1_ref, b1_ref, w2_ref, b2_ref, o_ref):
    # x_ref : (TILE_B, 16) f32   batch tile
    # w1_ref: (8, 16)      f32   lin1 weight, PyTorch (out_features, in_features)
    # b1_ref: (8, 1)       f32
    # w2_ref: (8, 1)       f32   lin2 weight transposed to (in_features, out_features)
    # b2_ref: (1, 1)       f32   in SMEM
    # o_ref : (1, TILE_B)  f32   lane-dense output (batch on the lane axis)
    xt = x_ref[...].T                                          # (16, TILE_B)
    h = jnp.dot(w1_ref[...], xt,
                preferred_element_type=jnp.float32)            # (8, TILE_B) on MXU
    h = h + b1_ref[...]                                        # lane broadcast
    s = jax.nn.sigmoid(h)                                      # f32 EUP
    # Second layer: weighted sum over the 8 hidden units (VPU mul + sublane reduce).
    out = jnp.sum(s * w2_ref[...], axis=0, keepdims=True) + b2_ref[0, 0]
    o_ref[...] = out.astype(o_ref.dtype)                       # (1, TILE_B)


def mlp_forward(x, w1, b1, w2, b2):
    """x: (B, 16) f32; w1: (8, 16); b1: (8, 1); w2: (8, 1); b2: (1, 1) -> (B, 1)."""
    B, F = x.shape
    assert F == 16, "expected 16 input features"

    tile_b = min(_MAX_TILE_B, _round_up(B, 128))   # multiple of 128 for lane-dense out
    b_padded = _round_up(B, tile_b)
    if b_padded != B:
        x = jnp.pad(x, ((0, b_padded - B), (0, 0)))
    grid = (b_padded // tile_b,)

    out_row = pl.pallas_call(
        mlp_kernel,
        out_shape=jax.ShapeDtypeStruct((1, b_padded), jnp.float32),
        grid=grid,
        in_specs=[
            # Batch-tiled activation (double-buffered by the pipeline).
            pl.BlockSpec((tile_b, 16), lambda i: (i, 0)),
            # Weights / biases: resident full blocks, never re-fetched per step.
            pl.BlockSpec((8, 16), lambda i: (0, 0)),
            pl.BlockSpec((8, 1), lambda i: (0, 0)),
            pl.BlockSpec((8, 1), lambda i: (0, 0)),
            # Scalar second-layer bias in SMEM.
            pl.BlockSpec((1, 1), lambda i: (0, 0),
                         memory_space=pltpu.MemorySpace.SMEM),
        ],
        out_specs=pl.BlockSpec((1, tile_b), lambda i: (0, i)),
        compiler_params=pltpu.CompilerParams(
            dimension_semantics=("parallel",)),
    )(x, w1, b1, w2, b2)

    return out_row[0, :B].reshape(B, 1)


def init_params(key):
    # Mimic nn.Linear's uniform(-1/sqrt(fan_in), 1/sqrt(fan_in)) init.
    k1, k2, k3, k4 = jax.random.split(key, 4)
    bound1 = 1.0 / jnp.sqrt(16.0)
    bound2 = 1.0 / jnp.sqrt(8.0)
    w1 = jax.random.uniform(k1, (8, 16), jnp.float32, -bound1, bound1)  # (out, in)
    b1 = jax.random.uniform(k2, (8, 1), jnp.float32, -bound1, bound1)
    w2 = jax.random.uniform(k3, (8, 1), jnp.float32, -bound2, bound2)   # (in, out)
    b2 = jax.random.uniform(k4, (1, 1), jnp.float32, -bound2, bound2)
    return w1, b1, w2, b2


def reference_forward(x, w1, b1, w2, b2):
    v1 = x @ w1.T + b1.reshape(1, -1)
    v2 = jax.nn.sigmoid(v1)
    return v2 @ w2 + b2


if __name__ == "__main__":
    key = jax.random.PRNGKey(0)
    kx, kp = jax.random.split(key)
    # Small batch consistent with the PyTorch example (x1 = torch.randn(1, 16)).
    B = 4
    x = jax.random.normal(kx, (B, 16), dtype=jnp.float32)
    w1, b1, w2, b2 = init_params(kp)

    out = mlp_forward(x, w1, b1, w2, b2)
    out = jax.block_until_ready(out)

    ref = reference_forward(x, w1, b1, w2, b2)
    assert out.shape == (B, 1), out.shape
    assert jnp.allclose(out, ref, atol=1e-4, rtol=1e-4), (out, ref)

    print("KERNEL_OK")
</pallas_src>

<mosaic_0001>
module attributes {stable_mosaic.version = 11 : i64} {
  func.func @mlp_kernel(%arg0: i32, %arg1: memref<128x16xf32, #tpu.memory_space<vmem>>, %arg2: memref<8x16xf32, #tpu.memory_space<vmem>>, %arg3: memref<8x1xf32, #tpu.memory_space<vmem>>, %arg4: memref<8x1xf32, #tpu.memory_space<vmem>>, %arg5: memref<1x1xf32, #tpu.memory_space<smem>>, %arg6: memref<1x128xf32, #tpu.memory_space<vmem>>) attributes {dimension_semantics = [#tpu.dimension_semantics<parallel>], iteration_bounds = array<i64: 1>, scalar_prefetch = 0 : i64, scratch_operands = 0 : i64, tpu.core_type = #tpu.core_type<tc>, window_params = [{transform_indices = @transform_0, window_bounds = array<i64: 128, 16>}, {pipeline_mode = #tpu.pipeline_mode<synchronous>, transform_indices = @transform_1, window_bounds = array<i64: 8, 16>}, {pipeline_mode = #tpu.pipeline_mode<synchronous>, transform_indices = @transform_2, window_bounds = array<i64: 8, 1>}, {pipeline_mode = #tpu.pipeline_mode<synchronous>, transform_indices = @transform_3, window_bounds = array<i64: 8, 1>}, {transform_indices = @transform_4, window_bounds = array<i64: 1, 1>}, {transform_indices = @transform_5, window_bounds = array<i64: 1, 128>}]} {
    %c0 = arith.constant 0 : index
    %c0_0 = arith.constant 0 : index
    %0 = vector.load %arg1[%c0, %c0_0] : memref<128x16xf32, #tpu.memory_space<vmem>>, vector<128x16xf32>
    %1 = tpu.transpose %0, [1, 0] : vector<128x16xf32> -> vector<16x128xf32>
    %c0_1 = arith.constant 0 : index
    %c0_2 = arith.constant 0 : index
    %2 = vector.load %arg2[%c0_1, %c0_2] : memref<8x16xf32, #tpu.memory_space<vmem>>, vector<8x16xf32>
    %cst = arith.constant dense<0.000000e+00> : vector<8x128xf32>
    %3 = tpu.matmul %2, %1, %cst {dimension_numbers = #tpu.dot_dimension_numbers<[1], [0], [0], [1], [0, 0, 1, 1], [], []>} : vector<8x16xf32>, vector<16x128xf32>, vector<8x128xf32> -> vector<8x128xf32>
    %c0_3 = arith.constant 0 : index
    %c0_4 = arith.constant 0 : index
    %4 = vector.load %arg3[%c0_3, %c0_4] : memref<8x1xf32, #tpu.memory_space<vmem>>, vector<8x1xf32>
    %5 = vector.broadcast %4 : vector<8x1xf32> to vector<8x128xf32>
    %6 = arith.addf %3, %5 : vector<8x128xf32>
    %7 = arith.negf %6 : vector<8x128xf32>
    %8 = math.exp %7 : vector<8x128xf32>
    %cst_5 = arith.constant 1.000000e+00 : f32
    %9 = vector.broadcast %cst_5 : f32 to vector<8x128xf32>
    %10 = arith.addf %9, %8 : vector<8x128xf32>
    %11 = arith.divf %9, %10 : vector<8x128xf32>
    %c0_6 = arith.constant 0 : index
    %c0_7 = arith.constant 0 : index
    %12 = vector.load %arg4[%c0_6, %c0_7] : memref<8x1xf32, #tpu.memory_space<vmem>>, vector<8x1xf32>
    %13 = vector.broadcast %12 : vector<8x1xf32> to vector<8x128xf32>
    %14 = arith.mulf %11, %13 : vector<8x128xf32>
    %cst_8 = arith.constant dense<0.000000e+00> : vector<128xf32>
    %15 = vector.multi_reduction <add>, %14, %cst_8 [0] : vector<8x128xf32> to vector<128xf32>
    %16 = vector.shape_cast %15 : vector<128xf32> to vector<1x128xf32>
    %c0_9 = arith.constant 0 : index
    %c0_10 = arith.constant 0 : index
    %17 = memref.load %arg5[%c0_9, %c0_10] : memref<1x1xf32, #tpu.memory_space<smem>>
    %18 = vector.broadcast %17 : f32 to vector<1x128xf32>
    %19 = arith.addf %16, %18 : vector<1x128xf32>
    %c0_11 = arith.constant 0 : index
    %c0_12 = arith.constant 0 : index
    %20 = vector.load %arg6[%c0_11, %c0_12] : memref<1x128xf32, #tpu.memory_space<vmem>>, vector<1x128xf32>
    tpu.vector_store %arg6[%c0_11, %c0_12], %19 {strides = array<i32>} : memref<1x128xf32, #tpu.memory_space<vmem>>, vector<1x128xf32>,
    return
  }
  func.func @transform_0(%arg0: i32) -> (i32, i32) {
    %c0_i32 = arith.constant 0 : i32
    %c0_i32_0 = arith.constant 0 : i32
    return %arg0, %c0_i32 : i32, i32
  }
  func.func @transform_1(%arg0: i32) -> (i32, i32) {
    %c0_i32 = arith.constant 0 : i32
    %c0_i32_0 = arith.constant 0 : i32
    %c0_i32_1 = arith.constant 0 : i32
    return %c0_i32, %c0_i32_0 : i32, i32
  }
  func.func @transform_2(%arg0: i32) -> (i32, i32) {
    %c0_i32 = arith.constant 0 : i32
    %c0_i32_0 = arith.constant 0 : i32
    %c0_i32_1 = arith.constant 0 : i32
    return %c0_i32, %c0_i32_0 : i32, i32
  }
  func.func @transform_3(%arg0: i32) -> (i32, i32) {
    %c0_i32 = arith.constant 0 : i32
    %c0_i32_0 = arith.constant 0 : i32
    %c0_i32_1 = arith.constant 0 : i32
    return %c0_i32, %c0_i32_0 : i32, i32
  }
  func.func @transform_4(%arg0: i32) -> (i32, i32) {
    %c0_i32 = arith.constant 0 : i32
    %c0_i32_0 = arith.constant 0 : i32
    %c0_i32_1 = arith.constant 0 : i32
    return %c0_i32, %c0_i32_0 : i32, i32
  }
  func.func @transform_5(%arg0: i32) -> (i32, i32) {
    %c0_i32 = arith.constant 0 : i32
    %c0_i32_0 = arith.constant 0 : i32
    return %c0_i32, %arg0 : i32, i32
  }
}

</mosaic_0001>

<bundles_post_ra>
// kernel: tpu_custom_call.1
= control target key start
LH: loop header
LB: loop body
LE: loop exit
PB: predicated region body
PF: predicated region fallthrough
CT: control target
= control target key end

     0   :  { %vm45_vm0 = vcmask 130048   ;;  %v305_v1 = vmov 0.0   ;;  %vm306_vm1 = vmmov 0   ;;  %v307_v2 = vmov 0   ;;  %s419_s0 = inlined_call_operand.vmem [shape: f32[128,16], index: 0, kind: input, shape index: {}]   ;;  %s420_s1 = inlined_call_operand.vmem [shape: f32[8,16], index: 1, kind: input, shape index: {}]   ;;  %s421_s2 = inlined_call_operand.vmem [shape: f32[8,1], index: 2, kind: input, shape index: {}]   ;;  %s422_s3 = inlined_call_operand.vmem [shape: f32[8,1], index: 3, kind: input, shape index: {}]   ;;  %s423_s4 = inlined_call_operand.<no memory space> [shape: f32[1,1], index: 4, kind: input, shape index: {}]   ;;  %s424_s5 = inlined_call_operand.hbm [shape: f32[1,128], index: 5, kind: output, shape index: {}]  }
   0x1   :  { %v37_v0 = vld [vmem:[%s419_s0 + $0x78] sm:$0xff]  ;;  %239 = vmatprep.subr.mxu0 %v305_v1  ;;  %271 = vmatprep.mubr.msk.f32.mxu0 %vm306_vm1, %v305_v1  ;;  %v36_v3 = vld [vmem:[%s419_s0 + $0x70] sm:$0xff]  ;;  %v39_v4 = vld [vmem:[%s421_s2] sm:$0xff] }
   0x2   :  { %240 = vmatpush3.xpose.msk.msra.mxu0 %vm45_vm0, %v37_v0  ;;  %278 = vset.pattern.permute.xlu0 %v307_v2 }
   0x3   :  { %241 = vmatprep.subr.mxu0 %v305_v1  ;;  %42 = vperm.xlu0 %278, %v39_v4  }
   0x6   :  { %242 = vmatpush3.xpose.msk.msra.mxu0 %vm45_vm0, %v36_v3 }
   0x7   :  { %11 = vsyncpa [#allocation4], 0  ;;  %243 = vmatprep.subr.mxu0 %v305_v1  ;;  %v35_v5 = vld [vmem:[%s419_s0 + $0x68] sm:$0xff]  ;;  %v173_v6 = vld [vmem:[%s422_s3] sm:$0xff]  ;;  %v187_v36 = vstv %s423_s4  ;;  %s308_s29 = smov [#allocation3]  }
   0x8   :  { %176 = vperm.xlu0 %278, %v173_v6   ;;  %v34_v7 = vld [vmem:[%s419_s0 + $0x60] sm:$0xff]  ;;  %v33_v8 = vld [vmem:[%s419_s0 + $0x58] sm:$0xff]  ;;  %v32_v9 = vld [vmem:[%s419_s0 + $0x50] sm:$0xff]  ;;  %s196_s2 = sshll.u32 %s308_s29, 4  ;;  %s197_s2 = int_to_ptr.vmem [resolvable:$true] %s196_s2 }
   0x9   :  { %v31_v10 = vld [vmem:[%s419_s0 + $0x48] sm:$0xff]  ;;  %v30_v11 = vld [vmem:[%s419_s0 + $0x40] sm:$0xff]  ;;  %v29_v12 = vld [vmem:[%s419_s0 + $0x38] sm:$0xff]  ;;  %s283_s30 = scalar_lea.vmem %s197_s2, 16  ;;  %s287_s6 = scalar_lea.vmem %s197_s2, 32 }
   0xa   :  { %244 = vmatpush3.xpose.msk.msra.mxu0 %vm45_vm0, %v35_v5  ;;  %v28_v13 = vld [vmem:[%s419_s0 + $0x30] sm:$0xff]  ;;  %v27_v14 = vld [vmem:[%s419_s0 + $0x28] sm:$0xff]  ;;  %v26_v15 = vld [vmem:[%s419_s0 + $0x20] sm:$0xff]  ;;  %p284_p0 = scmp.ne.s32.totalorder %s197_s2, %s283_s30  ;;  %p288_p1 = scmp.lt.s32.totalorder %s197_s2, %s197_s2 }
   0xb   :  { %245 = vmatprep.subr.mxu0 %v305_v1  ;;  %v25_v16 = vld [vmem:[%s419_s0 + $0x18] sm:$0xff]  ;;  %v24_v17 = vld [vmem:[%s419_s0 + $0x10] sm:$0xff]  ;;  %v23_v18 = vld [vmem:[%s419_s0 + $0x8] sm:$0xff]  ;;  %p289_p2 = scmp.lt.s32.totalorder %s287_s6, %s283_s30 }
   0xc   :  { %v22_v19 = vld [vmem:[%s419_s0] sm:$0xff] }
   0xd   :  { %v38_v20 = vld [vmem:[%s420_s1] sm:$0xff]  ;;  %p290_p3 = por %p289_p2, %p288_p1 }
   0xe   :  { %246 = vmatpush3.xpose.msk.msra.mxu0 %vm45_vm0, %v34_v7 }
   0xf   :  { %247 = vmatprep.subr.mxu0 %v305_v1  ;;  %p291_p4 = pnand %p290_p3, %p284_p0 }
  0x12   :  { %248 = vmatpush3.xpose.msk.msra.mxu0 %vm45_vm0, %v33_v8 }
  0x13   :  { %249 = vmatprep.subr.mxu0 %v305_v1 }
  0x16   :  { %250 = vmatpush3.xpose.msk.msra.mxu0 %vm45_vm0, %v32_v9 }
  0x17   :  { %251 = vmatprep.subr.mxu0 %v305_v1 }
  0x1a   :  { %252 = vmatpush3.xpose.msk.msra.mxu0 %vm45_vm0, %v31_v10 }
  0x1b   :  { %253 = vmatprep.subr.mxu0 %v305_v1 }
  0x1e   :  { %254 = vmatpush3.xpose.msk.msra.mxu0 %vm45_vm0, %v30_v11 }
  0x1f   :  { %255 = vmatprep.subr.mxu0 %v305_v1 }
  0x22   :  { %256 = vmatpush3.xpose.msk.msra.mxu0 %vm45_vm0, %v29_v12 }
  0x23   :  { %257 = vmatprep.subr.mxu0 %v305_v1 }
  0x26   :  { %258 = vmatpush3.xpose.msk.msra.mxu0 %vm45_vm0, %v28_v13 }
  0x27   :  { %259 = vmatprep.subr.mxu0 %v305_v1 }
  0x2a   :  { %260 = vmatpush3.xpose.msk.msra.mxu0 %vm45_vm0, %v27_v14 }
  0x2b   :  { %261 = vmatprep.subr.mxu0 %v305_v1 }
  0x2e   :  { %262 = vmatpush3.xpose.msk.msra.mxu0 %vm45_vm0, %v26_v15 }
  0x2f   :  { %263 = vmatprep.subr.mxu0 %v305_v1 }
  0x32   :  { %264 = vmatpush3.xpose.msk.msra.mxu0 %vm45_vm0, %v25_v16 }
  0x33   :  { %265 = vmatprep.subr.mxu0 %v305_v1 }
  0x36   :  { %266 = vmatpush3.xpose.msk.msra.mxu0 %vm45_vm0, %v24_v17 }
  0x37   :  { %267 = vmatprep.subr.mxu0 %v305_v1 }
  0x3a   :  { %268 = vmatpush3.xpose.msk.msra.mxu0 %vm45_vm0, %v23_v18 }
  0x3b   :  { %269 = vmatprep.subr.mxu0 %v305_v1 }
  0x3e   :  { %270 = vmatpush3.xpose.msk.msra.mxu0 %vm45_vm0, %v22_v19 }
  0x41   :  { %272 = vmatmul.mubr.msk.f32.vlgmr.msra.gmra.mxu0 %vm45_vm0, %v38_v20 }
  0x7e   :  { %v43_v21 = vpop.permute.xlu0 %42 }
  0x83   :  { %v177_v29 = vpop.permute.xlu0 %176 }
 0x101   :  { %v163_v22 = vpop.f32.mrf.mxu0 }
 0x102   :  { %v164_v23 = vadd.f32 %v163_v22, %v43_v21 }
 0x103   :  { %v273_v24 = vpop.f32.mrf.mxu0 }
 0x104   :  { %v221_v25 = vmul.f32 -1.442695, %v164_v23 }
 0x106   :  { %279 = vpow2.f32 %v221_v25 }
 0x113   :  { %v280_v26 = vpop.eup %279 }
 0x114   :  { %v170_v27 = vadd.f32 1.0, %v280_v26 }
 0x116   :  { %281 = vrcp.f32 %v170_v27 }
 0x123   :  { %v282_v28 = vpop.eup %281 }
 0x124   :  { %v179_v30 = vmul.f32 %v282_v28, %v177_v29 }
 0x126   :  { %v180_v31 = vrot.slane %v179_v30, 4 }
 0x128   :  { %v181_v32 = vadd.f32 %v180_v31, %v179_v30 }
 0x12a   :  { %v182_v33 = vrot.slane %v181_v32, 2 }
 0x12c   :  { %v183_v34 = vadd.f32 %v182_v33, %v181_v32 }
 0x12e   :  { %v184_v35 = vrot.slane %v183_v34, 1 }
 0x130   :  { %v185_v37 = vadd.f32 %v184_v35, %v183_v34 }
 0x132   :  { %v188_v38 = vadd.f32 %v187_v36, %v185_v37 }
 0x134   :  { %189 = vst [vmem:[#allocation3] sm:$0x1] %v188_v38 }
 0x135   :  { %294 = shalt.err (!%p291_p4)
}
 0x136   :  { %199 = dma.vmem_to_hbm [thread:$0]  %s197_s2, 16, %s424_s5, [#allocation4]  }
 0x137   :  { %303 = dma.done.wait [#allocation4], 16  }
 0x138   :  { %304 = vsyncadd [#allocation4], 4294967280 }
 0x139   :  { %203 = vsyncpa [#allocation4], 1 }

</bundles_post_ra>
